<compile_context>
chip_gen: v6e
topology: v6e:2x2x1
jax: 0.10.0
libtpu: 0.0.40
codegen_flags: <defaults>
</compile_context>

<pallas_src>
import functools

import jax
import jax.numpy as jnp
import numpy as np
from jax.experimental import pallas as pl
from jax.experimental.pallas import tpu as pltpu

LANE = 128


def _device_budgets():
    """Returns (vmem_limit_bytes, streaming_tile_bytes, fused_block_bytes)."""
    # Conservative defaults work on every generation (v7x has only 64 MiB VMEM).
    vmem_limit, tile_target, fused_block = 32 << 20, 2 << 20, 4 << 20
    try:
        cap = int(pltpu.get_tpu_info().vmem_capacity_bytes)
        if cap > (64 << 20):        # v5e / v6e: 128 MiB VMEM -> bigger tiles
            vmem_limit, tile_target, fused_block = 64 << 20, 4 << 20, 8 << 20
    except Exception:
        pass
    return vmem_limit, tile_target, fused_block


# ----------------------------- kernels ------------------------------------ #

def _fused_kernel(x_ref, w_ref, b_ref, o_ref):
    """Fused pool -> (1x1 conv + softmax) -> scale for one resident (nb, C, HW) block.

    x_ref/o_ref: (nb, C, HW); w_ref: (C, C) = W.T / HW; b_ref: (1, C).
    x is read from HBM once and written once.
    """
    xf = x_ref[...].astype(jnp.float32)
    pooled = jnp.sum(xf, axis=-1)                                     # (nb, C), 1/HW folded in w
    s = jnp.dot(pooled, w_ref[...], preferred_element_type=jnp.float32) + b_ref[...]
    m = jnp.max(s, axis=-1, keepdims=True)
    e = jnp.exp(s - m)
    a = e / jnp.sum(e, axis=-1, keepdims=True)                        # (nb, C) softmax
    o_ref[...] = (xf * a[:, :, None]).astype(o_ref.dtype)


def _pool_sum_kernel(x_ref, sum_ref, *, hw, hw_tile, mask_tail):
    """Streaming channel-sum. x_ref: (1, C, hw_tile); sum_ref: (1, C, 1) f32 accumulator."""
    @pl.when(pl.program_id(1) == 0)
    def _():
        sum_ref[...] = jnp.zeros_like(sum_ref)

    xf = x_ref[...].astype(jnp.float32)
    if mask_tail:
        # Ragged HW tail: OOB lanes of the last block hold garbage -> mask them out.
        lane = jax.lax.broadcasted_iota(jnp.int32, xf.shape, dimension=2)
        valid = hw - pl.program_id(1) * hw_tile
        xf = jnp.where(lane < valid, xf, 0.0)
    sum_ref[...] += jnp.sum(xf, axis=-1, keepdims=True)


def _scale_kernel(x_ref, a_ref, o_ref):
    """x_ref/o_ref: (1, C, hw_tile); a_ref: (1, C, 1) f32. Multiply in f32, cast once."""
    o_ref[...] = (x_ref[...].astype(jnp.float32) * a_ref[...]).astype(o_ref.dtype)


# ----------------------------- wrapper ------------------------------------ #

def mse_module(x, w, b, *, tile_target_bytes=None, fused_block_bytes=None,
               vmem_limit_bytes=None):
    """x: (N, C, H, W); w: (C, C) from Conv2d(C, C, 1); b: (C,). Returns (N, C, H, W)."""
    N, C, H, W = x.shape
    HW = H * W
    itemsize = int(jnp.dtype(x.dtype).itemsize)

    d_vmem, d_tile, d_fused = _device_budgets()
    vmem_limit = d_vmem if vmem_limit_bytes is None else int(vmem_limit_bytes)
    tile_target = d_tile if tile_target_bytes is None else int(tile_target_bytes)
    fused_block = d_fused if fused_block_bytes is None else int(fused_block_bytes)

    x_flat = x.reshape(N, C, HW)
    # Fold 1/HW of the mean into the (transposed) weight: s = sum(x) @ (W.T/HW) + b.
    w_eff = (jnp.transpose(w) * (1.0 / HW)).astype(jnp.float32)        # (C_in, C_out)
    b2 = b.reshape(1, C).astype(jnp.float32)

    per_n_bytes = C * HW * itemsize
    weight_bytes = C * C * 4

    # --------------------- Path A: fused single pass ------------------------
    if per_n_bytes <= fused_block and weight_bytes <= (2 << 20):
        nb = max(1, fused_block // per_n_bytes)
        if N >= 2:
            nb = min(nb, N // 2)       # >= 2 grid steps so both v7x TensorCores work
        nb = max(1, min(nb, N))
        grid = (pl.cdiv(N, nb),)

        out_flat = pl.pallas_call(
            _fused_kernel,
            out_shape=jax.ShapeDtypeStruct((N, C, HW), x.dtype),
            grid_spec=pltpu.PrefetchScalarGridSpec(
                num_scalar_prefetch=0,
                grid=grid,
                in_specs=[pl.BlockSpec((nb, C, HW), lambda n: (n, 0, 0)),
                          pl.BlockSpec((C, C), lambda n: (0, 0)),
                          pl.BlockSpec((1, C), lambda n: (0, 0))],
                out_specs=pl.BlockSpec((nb, C, HW), lambda n: (n, 0, 0)),
            ),
            compiler_params=pltpu.CompilerParams(
                dimension_semantics=("parallel",),
                vmem_limit_bytes=vmem_limit),
            cost_estimate=pl.CostEstimate(
                flops=2 * N * C * HW + 2 * N * C * C,
                transcendentals=N * C,
                bytes_accessed=2 * N * C * HW * itemsize + C * C * 4),
        )(x_flat, w_eff, b2)
        return out_flat.reshape(N, C, H, W)

    # --------------- Path B: streaming pool -> attn -> scale ----------------
    # HW tiling: lane-aligned tiles of ~tile_target bytes; no padding of x, the
    # ragged tail is handled by the cdiv grid + in-kernel mask / masked writes.
    cap = max(LANE, ((tile_target // (C * itemsize)) // LANE) * LANE)
    hw_tile = HW if HW <= cap else cap
    n_hw = pl.cdiv(HW, hw_tile)
    mask_tail = (HW % hw_tile) != 0

    pool_kernel = functools.partial(_pool_sum_kernel, hw=HW, hw_tile=hw_tile,
                                    mask_tail=mask_tail)
    sums = pl.pallas_call(
        pool_kernel,
        out_shape=jax.ShapeDtypeStruct((N, C, 1), jnp.float32),
        grid_spec=pltpu.PrefetchScalarGridSpec(
            num_scalar_prefetch=0,
            grid=(N, n_hw),
            in_specs=[pl.BlockSpec((1, C, hw_tile), lambda n, t: (n, 0, t),
                                   pipeline_mode=pl.Buffered(3))],
            out_specs=pl.BlockSpec((1, C, 1), lambda n, t: (n, 0, 0)),
        ),
        compiler_params=pltpu.CompilerParams(
            dimension_semantics=("parallel", "arbitrary"),
            vmem_limit_bytes=vmem_limit),
        cost_estimate=pl.CostEstimate(
            flops=N * C * HW, transcendentals=0,
            bytes_accessed=N * C * HW * itemsize + N * C * 4),
    )(x_flat)

    # Tiny (N, C) @ (C, C) + softmax: done in plain XLA so arbitrarily large C
    # never risks a VMEM overflow (negligible vs. the streaming passes).
    s = sums.reshape(N, C) @ w_eff + b2
    attn = jax.nn.softmax(s, axis=-1).reshape(N, C, 1).astype(jnp.float32)

    out_flat = pl.pallas_call(
        _scale_kernel,
        out_shape=jax.ShapeDtypeStruct((N, C, HW), x.dtype),
        grid_spec=pltpu.PrefetchScalarGridSpec(
            num_scalar_prefetch=0,
            grid=(N, n_hw),
            in_specs=[pl.BlockSpec((1, C, hw_tile), lambda n, t: (n, 0, t)),
                      pl.BlockSpec((1, C, 1), lambda n, t: (n, 0, 0))],
            out_specs=pl.BlockSpec((1, C, hw_tile), lambda n, t: (n, 0, t)),
        ),
        compiler_params=pltpu.CompilerParams(
            dimension_semantics=("parallel", "parallel"),
            vmem_limit_bytes=vmem_limit),
        cost_estimate=pl.CostEstimate(
            flops=N * C * HW, transcendentals=0,
            bytes_accessed=2 * N * C * HW * itemsize + N * C * 4),
    )(x_flat, attn)

    return out_flat.reshape(N, C, H, W)


# ----------------------------- reference ---------------------------------- #

def _reference(x, w, b):
    pooled = x.mean(axis=(2, 3))                    # (N, C)
    s = pooled @ w.T + b[None, :]                   # (N, C)
    a = jax.nn.softmax(s, axis=1)                   # (N, C)
    return x * a[:, :, None, None]


if __name__ == "__main__":
    key = jax.random.PRNGKey(0)
    k_x, k_w, k_b, k_x2 = jax.random.split(key, 4)

    N, C, H, W = 2, 4, 16, 16
    x = jax.random.normal(k_x, (N, C, H, W), dtype=jnp.float32)
    # "Conv2d(C, C, 1)" params: weight (C, C, 1, 1) -> (C, C), bias (C,)
    fc_w = jax.random.normal(k_w, (C, C), dtype=jnp.float32) * 0.1
    fc_b = jax.random.normal(k_b, (C,), dtype=jnp.float32) * 0.1

    # Case 1: fused single-pass fast path (small spatial extent fits VMEM).
    out = jax.block_until_ready(mse_module(x, fc_w, fc_b))
    np.testing.assert_allclose(np.asarray(out), np.asarray(_reference(x, fc_w, fc_b)),
                               rtol=1e-5, atol=1e-5)

    # Case 2: force the streaming 3-pass path (cdiv grids, ragged 144-element HW
    # tail masked in-kernel, batch not folded) by shrinking the budgets.
    N2, H2, W2 = 3, 12, 12
    x2 = jax.random.normal(k_x2, (N2, C, H2, W2), dtype=jnp.float32)
    out2 = jax.block_until_ready(
        mse_module(x2, fc_w, fc_b, fused_block_bytes=1, tile_target_bytes=1))
    np.testing.assert_allclose(np.asarray(out2), np.asarray(_reference(x2, fc_w, fc_b)),
                               rtol=1e-5, atol=1e-5)

    print("KERNEL_OK")
</pallas_src>

<mosaic_0001>
module attributes {stable_mosaic.version = 11 : i64} {
  func.func @_fused_kernel(%arg0: i32, %arg1: memref<1x4x256xf32, #tpu.memory_space<vmem>>, %arg2: memref<4x4xf32, #tpu.memory_space<vmem>>, %arg3: memref<1x4xf32, #tpu.memory_space<vmem>>, %arg4: memref<1x4x256xf32, #tpu.memory_space<vmem>>) attributes {dimension_semantics = [#tpu.dimension_semantics<parallel>], iteration_bounds = array<i64: 2>, scalar_prefetch = 0 : i64, scratch_operands = 0 : i64, tpu.core_type = #tpu.core_type<tc>, window_params = [{transform_indices = @transform_0, window_bounds = array<i64: 1, 4, 256>}, {pipeline_mode = #tpu.pipeline_mode<synchronous>, transform_indices = @transform_1, window_bounds = array<i64: 4, 4>}, {pipeline_mode = #tpu.pipeline_mode<synchronous>, transform_indices = @transform_2, window_bounds = array<i64: 1, 4>}, {transform_indices = @transform_3, window_bounds = array<i64: 1, 4, 256>}]} {
    %c0 = arith.constant 0 : index
    %c0_0 = arith.constant 0 : index
    %c0_1 = arith.constant 0 : index
    %0 = vector.load %arg1[%c0, %c0_0, %c0_1] : memref<1x4x256xf32, #tpu.memory_space<vmem>>, vector<1x4x256xf32>
    %cst = arith.constant dense<0.000000e+00> : vector<1x4xf32>
    %1 = vector.multi_reduction <add>, %0, %cst [2] : vector<1x4x256xf32> to vector<1x4xf32>
    %c0_2 = arith.constant 0 : index
    %c0_3 = arith.constant 0 : index
    %2 = vector.load %arg2[%c0_2, %c0_3] : memref<4x4xf32, #tpu.memory_space<vmem>>, vector<4x4xf32>
    %cst_4 = arith.constant dense<0.000000e+00> : vector<1x4xf32>
    %3 = tpu.matmul %1, %2, %cst_4 {dimension_numbers = #tpu.dot_dimension_numbers<[1], [0], [0], [1], [0, 0, 1, 1], [], []>} : vector<1x4xf32>, vector<4x4xf32>, vector<1x4xf32> -> vector<1x4xf32>
    %c0_5 = arith.constant 0 : index
    %c0_6 = arith.constant 0 : index
    %4 = vector.load %arg3[%c0_5, %c0_6] : memref<1x4xf32, #tpu.memory_space<vmem>>, vector<1x4xf32>
    %5 = arith.addf %3, %4 : vector<1x4xf32>
    %cst_7 = arith.constant dense<0xFF800000> : vector<1xf32>
    %6 = vector.multi_reduction <maximumf>, %5, %cst_7 [1] : vector<1x4xf32> to vector<1xf32>
    %7 = vector.shape_cast %6 : vector<1xf32> to vector<1x1xf32>
    %8 = vector.broadcast %7 : vector<1x1xf32> to vector<1x4xf32>
    %9 = arith.subf %5, %8 : vector<1x4xf32>
    %10 = math.exp %9 : vector<1x4xf32>
    %cst_8 = arith.constant dense<0.000000e+00> : vector<1xf32>
    %11 = vector.multi_reduction <add>, %10, %cst_8 [1] : vector<1x4xf32> to vector<1xf32>
    %12 = vector.shape_cast %11 : vector<1xf32> to vector<1x1xf32>
    %13 = vector.broadcast %12 : vector<1x1xf32> to vector<1x4xf32>
    %14 = arith.divf %10, %13 : vector<1x4xf32>
    %15 = vector.shape_cast %14 : vector<1x4xf32> to vector<1x4x1xf32>
    %16 = vector.broadcast %15 : vector<1x4x1xf32> to vector<1x4x256xf32>
    %17 = arith.mulf %0, %16 : vector<1x4x256xf32>
    %c0_9 = arith.constant 0 : index
    %c0_10 = arith.constant 0 : index
    %c0_11 = arith.constant 0 : index
    %18 = vector.load %arg4[%c0_9, %c0_10, %c0_11] : memref<1x4x256xf32, #tpu.memory_space<vmem>>, vector<1x4x256xf32>
    tpu.vector_store %arg4[%c0_9, %c0_10, %c0_11], %17 {strides = array<i32>} : memref<1x4x256xf32, #tpu.memory_space<vmem>>, vector<1x4x256xf32>,
    return
  }
  func.func @transform_0(%arg0: i32) -> (i32, i32, i32) {
    %c0_i32 = arith.constant 0 : i32
    %c0_i32_0 = arith.constant 0 : i32
    %c0_i32_1 = arith.constant 0 : i32
    return %arg0, %c0_i32, %c0_i32_0 : i32, i32, i32
  }
  func.func @transform_1(%arg0: i32) -> (i32, i32) {
    %c0_i32 = arith.constant 0 : i32
    %c0_i32_0 = arith.constant 0 : i32
    %c0_i32_1 = arith.constant 0 : i32
    return %c0_i32, %c0_i32_0 : i32, i32
  }
  func.func @transform_2(%arg0: i32) -> (i32, i32) {
    %c0_i32 = arith.constant 0 : i32
    %c0_i32_0 = arith.constant 0 : i32
    %c0_i32_1 = arith.constant 0 : i32
    return %c0_i32, %c0_i32_0 : i32, i32
  }
  func.func @transform_3(%arg0: i32) -> (i32, i32, i32) {
    %c0_i32 = arith.constant 0 : i32
    %c0_i32_0 = arith.constant 0 : i32
    %c0_i32_1 = arith.constant 0 : i32
    return %arg0, %c0_i32, %c0_i32_0 : i32, i32, i32
  }
}

</mosaic_0001>

<bundles_post_ra>
// kernel: tpu_custom_call.1
= control target key start
LH: loop header
LB: loop body
LE: loop exit
PB: predicated region body
PF: predicated region fallthrough
CT: control target
= control target key end

     0   :  { %8 = vsyncpa [#allocation3], 0  ;;  %s835_s0 = inlined_call_operand.hbm [shape: f32[2,4,256], index: 0, kind: input, shape index: {}]   ;;  %s836_s1 = inlined_call_operand.hbm [shape: f32[4,4], index: 1, kind: input, shape index: {}]   ;;  %s837_s2 = inlined_call_operand.vmem [shape: f32[1,4], index: 2, kind: input, shape index: {}]   ;;  %s838_s3 = inlined_call_operand.hbm [shape: f32[2,4,256], index: 3, kind: output, shape index: {}]  }
   0x1   :  { %10 = vsyncpa [#allocation3 + $0x1], 0 }
   0x2   :  { %11 = vsyncpa [#allocation6], 0 }
   0x3   :  { %12 = vsyncpa [#allocation4], 0 }
   0x4   :  { %14 = vsyncpa [#allocation4 + $0x1], 0  ;;  %s662_s12 = smov 0   ;;  %s664_s13 = smov 0  }
   0x5   :  { %s666_s14 = smov 0   ;;  %s668_s15 = smov 0  }
   0x6 LB: > { %s683_s16 = sadd.s32 4294967295, %s634_s15   ;;  %s420_s17 = sadd.s32 4294967294, %s634_s15   ;;  %s634_s15 = sphi %s668_s15, %s861_s15   ;;  %s630_s14 = sphi %s666_s14, %s860_s14   ;;  %s626_s13 = sphi %s664_s13, %s859_s13   ;;  %s622_s12 = sphi %s662_s12, %s858_s12  }
   0x7   : > { %p40_p0 = scmp.ne.s32.totalorder %s626_s13, %s622_s12  ;;  %p839_p1 = scmp.eq.s32.totalorder %s683_s16, 0 }
   0x8   : > { %p112_p3 = scmp.eq.s32.totalorder %s420_s17, 1  ;;  %p421_p5 = scmp.ge.s32.totalorder %s634_s15, 1 }
   0x9   : > { %p692_p4 = por %p839_p1, %p40_p0  ;;  %p119_p7 = scmp.lt.s32.totalorder %s634_s15, 3 }
   0xa   : > { %p697_p6 = por %p112_p3, %p40_p0  ;;  %s636_s21 = smov [#allocation5]  }
   0xb   : > { %s843_s18 = scalar_select %p692_p4, 1, 0 }
   0xc   : > { %s844_s19 = scalar_select %p697_p6, 1, 0 }
   0xd   : > { %p702_p8 = pnand %p421_p5, %p119_p7  ;;  %s132_s22 = sshll.u32 %s636_s21, 4  ;;  %s133_s22 = int_to_ptr.vmem [resolvable:$true] %s132_s22 }
   0xe   : > { %s710_s23 = sadd.s32 1, %s634_s15   ;;  %s27_s27 = sadd.s32 1, %s630_s14 }
   0xf   : > { %s845_s20 = scalar_select %p702_p8, 1, 0 }
  0x10   : > { %p455_p10 = pneg %p702_p8  ;;  %s24_s25 = ssub.s32 %s634_s15, %s710_s23 }
  0x11   : > { %p720_p12 = scmp.eq.s32.totalorder %s24_s25, 0  ;;  %p34_p13 = scmp.ne.s32.totalorder %s630_s14, %s626_s13 }
  0x12   : > { %p714_p11 = pnand %p455_p10, %p839_p1  ;;  %s523_s28 = scalar_lea.vmem %s133_s22, 64 }
  0x13   : > { %p524_p3 = scmp.ne.s32.totalorder %s133_s22, %s523_s28  ;;  %p531_p9 = scmp.lt.s32.totalorder %s133_s22, %s133_s22 }
  0x14   : > { %p514_p0 = pneg %p714_p11  ;;  %p532_p2 = scmp.lt.s32.totalorder %s523_s28, %s523_s28 }
  0x16   : > { %p526_p5 = pnand %p524_p3, %p514_p0  ;;  %p533_p10 = por %p532_p2, %p531_p9 }
  0x18   : > { %p527_p7 = pneg %p526_p5 }
  0x1a   : > { %p534_p1 = pnand %p533_p10, %p527_p7 }
  0x1c   : > { %537 = shalt.err (!%p534_p1)
}
  0x1d   : > { %458 = dma.hbm_to_vmem [thread:$0]  (!%p714_p11), %s836_s1, 64, %s133_s22, [#allocation6]  }
  0x1e   : > { %s737_s4 = scalar_select %p720_p12, %s630_s14, %s27_s27  }
  0x1f   : > { %p35_p1 = scmp.eq.s32.totalorder %s634_s15, 0  ;;  %p848_p2 = scmp.eq.s32.totalorder %s683_s16, 1 }
  0x20   : > { %p468_p0 = scmp.lt.s32.totalorder %s634_s15, 2  ;;  %s146_s6 = sand.u32 1, %s630_s14  }
  0x21   : > { %p745_p9 = por %p848_p2, %p34_p13  ;;  %p36_p3 = por %p35_p1, %p34_p13 }
  0x22   : > { %s424_s7 = sshll.u32 %s146_s6, 3  ;;  %s438_s8 = sshll.u32 %s634_s15, 7 }
  0x23   : > { %s849_s5 = scalar_select %p745_p9, 1, 0 }
  0x24   : > { %s758_s11 = scalar_lea.hbm %s835_s0, %s438_s8  ;;  %s150_s17 = scalar_lea.vmem [#allocation2], %s424_s7 }
  0x25   : > { %s158_s21 = sshll.u32 %s150_s17, 4  ;;  %p760_p11 = pnand %p468_p0, %p36_p3  ;;  %s159_s21 = int_to_ptr.vmem [resolvable:$true] %s158_s21 }
  0x26   : > { %s147_s24 = scalar_lea.sflag [#allocation3], %s146_s6  ;;  %s538_s25 = scalar_lea.hbm %s758_s11, 128 }
  0x27   : > { %p539_p12 = scmp.ne.s32.totalorder %s758_s11, %s538_s25  ;;  %p540_p13 = pneg %p760_p11 }
  0x28   : > { %s543_s28 = scalar_lea.hbm %s835_s0, 256  ;;  %p544_p10 = scmp.lt.s32.totalorder %s758_s11, %s835_s0 }
  0x29   : > { %p541_p5 = pnand %p540_p13, %p539_p12  ;;  %p545_p1 = scmp.lt.s32.totalorder %s543_s28, %s538_s25 }
  0x2b   : > { %p542_p7 = pneg %p541_p5  ;;  %p546_p2 = por %p545_p1, %p544_p10 }
  0x2d   : > { %p547_p0 = pnand %p546_p2, %p542_p7 }
  0x2f   : > { %550 = shalt.err (!%p547_p0)
}
  0x30   : > { %s551_s7 = scalar_lea.vmem %s159_s21, 128  ;;  %s637_s6 = smov [#allocation2]  }
  0x31   : > { %p552_p3 = scmp.ne.s32.totalorder %s159_s21, %s551_s7  ;;  %s556_s8 = sshll.u32 %s637_s6, 4  ;;  %s557_s8 = int_to_ptr.vmem [resolvable:$false] %s556_s8 }
  0x32   : > { %s558_s9 = scalar_lea.vmem %s557_s8, 256  ;;  %p559_p12 = scmp.lt.s32.totalorder %s159_s21, %s557_s8 }
  0x33   : > { %p554_p6 = pnand %p552_p3, %p540_p13  ;;  %p560_p5 = scmp.lt.s32.totalorder %s558_s9, %s551_s7 }
  0x35   : > { %p555_p9 = pneg %p554_p6  ;;  %p561_p4 = por %p560_p5, %p559_p12 }
  0x37   : > { %p562_p8 = pnand %p561_p4, %p555_p9 }
  0x39   : > { %565 = shalt.err (!%p562_p8)
}
  0x3a   : > { %462 = dma.hbm_to_vmem [thread:$0]  (!%p760_p11), %s758_s11, 128, %s159_s21, %s147_s24  }
  0x3b   : > { %p851_p7 = scmp.ne.s32.totalorder %s845_s20, 0 }
  0x3c   : > { %s781_s10 = sand.u32 (!%p851_p7), 1, %s626_s13   ;;  %p852_p4 = scmp.ne.s32.totalorder (!%p851_p7), %s843_s18, 0 }
  0x3d   : > { %167 = sbr.rel (%p851_p7) target bundleno = 857 (0x359), region = 32  ;;  %s428_s17 = sshll.u32 (!%p851_p7), %s781_s10, 3 }
  0x3e   : > { %s170_s25 = scalar_lea.sflag (!%p851_p7), [#allocation3], %s781_s10  ;;  %s173_s26 = scalar_lea.vmem (!%p851_p7), [#allocation2], %s428_s17 }
  0x42   : > { %609 = dma.done.wait (%p852_p4), %s170_s25, 128  }
  0x43   : > { %611 = vsyncadd (%p852_p4), %s170_s25, 4294967168  ;;  %p853_p6 = scmp.eq.s32.totalorder %s683_s16, 0 }
  0x45   : > { %613 = dma.done.wait (%p853_p6), [#allocation6], 64   ;;  %p854_p8 = pmov %p853_p6 }
  0x46   : > { %vm204_vm0 = vcmask 1043456   ;;  %v200_v0 = vld [vmem:[%s173_s26] sm:$0xff]  ;;  %v638_v5 = vmov 0.0   ;;  %v210_v6 = vld [vmem:[#allocation5] sm:$0xf]  ;;  %vm639_vm1 = vmmov 0   ;;  %v213_v7 = vlaneseq }
  0x47   : > { %615 = vsyncadd (%p854_p8), [#allocation6], 4294967232  ;;  %v202_v1 = vcombine.high %v200_v0, %v200_v0  ;;  %v205_v2 = vsel %vm204_vm0, %v200_v0, 0.0  ;;  %442 = vmatprep.subr.mxu0 %v638_v5  ;;  %444 = vmatprep.mubr.msk.f32.mxu0 %vm639_vm1, %v638_v5  ;;  %vm219_vm2 = vcmask 31744   ;;  %v211_v13 = vld [vmem:[%s837_s2] sm:$0x1] }
  0x48   : > { %443 = vmatpush3.msk.msra.mxu0 %vm204_vm0, %v210_v6  ;;  %v214_v8 = vand.u32 127, %v213_v7  ;;  %v216_v9 = vshrl.u32 %v213_v7, 7  ;;  %vm295_vm3 = vcmask 24576   ;;  %v640_v28 = vmov 839922192   ;;  %s439_s11 = sshll.u32 %s683_s16, 7 }
  0x49   : > { %v206_v3 = vsel %vm204_vm0, %v202_v1, 0.0  ;;  %v316_v29 = vunpack.c.l.s4 %v640_v28  ;;  %s199_s21 = scalar_lea.vmem [#allocation7], %s428_s17  ;;  %s338_s28 = scalar_lea.hbm %s838_s3, %s439_s11 }
  0x4a   : > { %v207_v4 = vadd.f32 %v206_v3, %v205_v2  ;;  %v217_v10 = vsub.s32 %v214_v8, %v216_v9  ;;  %v309_v24 = vsub.s32 0, %v216_v9  ;;  %s340_s22 = sshll.u32 %s199_s21, 4  ;;  %s326_s29 = scalar_lea.sflag [#allocation4], %s781_s10  ;;  %s341_s22 = int_to_ptr.vmem [resolvable:$true] %s340_s22 }
  0x4b   : > { %v317_v30 = vunpack.c.0.s8 %v316_v29  ;;  %s566_s30 = scalar_lea.vmem %s341_s22, 128  ;;  %p855_p11 = scmp.ne.s32.totalorder %s849_s5, 0 }
  0x4c   : > { %208 = vadd.xlane.f32.xlu0 %v207_v4  ;;  %p567_p9 = scmp.ne.s32.totalorder %s341_s22, %s566_s30  ;;  %s641_s7 = smov [#allocation7]  }
  0x4d   : > { %v320_v31 = vsub.s32 %v317_v30, %v216_v9  ;;  %s570_s6 = sshll.u32 %s641_s7, 4  ;;  %s571_s6 = int_to_ptr.vmem [resolvable:$false] %s570_s6 }
  0x4e   : > { %p568_p13 = pnand %p567_p9, %p855_p11  ;;  %s572_s16 = scalar_lea.vmem %s571_s6, 256 }
  0x4f   : > { %p573_p1 = scmp.lt.s32.totalorder %s341_s22, %s571_s6  ;;  %p574_p2 = scmp.lt.s32.totalorder %s572_s16, %s566_s30 }
  0x50   : > { %p569_p10 = pneg %p568_p13 }
  0x51   : > { %p575_p0 = por %p574_p2, %p573_p1 }
  0x53   : > { %p576_p3 = pnand %p575_p0, %p569_p10 }
  0xd5   : > { %v209_v11 = vpop.xlane.xlu0 %208 }
  0xd6   : > { %v218_v12 = vrot.slane %v209_v11, %v217_v10 }
  0xd8   : > { %445 = vmatmul.mubr.msk.f32.vlgmr.msra.gmra.mxu0 %vm219_vm2, %v218_v12 }
 0x198   : > { %v291_v14 = vpop.f32.mrf.mxu0 }
 0x199   : > { %v292_v15 = vadd.f32 %v291_v14, %v211_v13 }
 0x19a   : > { %v446_v16 = vpop.f32.mrf.mxu0 }
 0x19b   : > { %v296_v17 = vsel %vm295_vm3, %v292_v15, -inf }
 0x19c   : > { %297 = vmax.xlane.f32.xlu0 %v296_v17 }
 0x225   : > { %v298_v18 = vpop.xlane.xlu0 %297 }
 0x226   : > { %v299_v19 = vsub.f32 %v292_v15, %v298_v18 }
 0x228   : > { %v300_v20 = vmul.f32 1.442695, %v299_v19 }
 0x22a   : > { %508 = vpow2.f32 %v300_v20 }
 0x237   : > { %v509_v21 = vpop.eup %508 }
 0x238   : > { %v302_v22 = vsel %vm295_vm3, %v509_v21, 0.0 }
 0x239   : > { %303 = vadd.xlane.f32.xlu1 %v302_v22 }
 0x2c2   : > { %v304_v23 = vpop.xlane.xlu1 %303 }
 0x2c3   : > { %510 = vrcp.f32 %v304_v23 }
 0x2d0   : > { %v511_v25 = vpop.eup %510 }
 0x2d1   : > { %v306_v26 = vmul.f32 %v511_v25, %v509_v21 }
 0x2d3   : > { %v310_v27 = vrot.slane %v306_v26, %v309_v24 }
 0x2d5   : > { %312 = vbcast.lane.b32.xlu1 %v310_v27, 256 }
 0x347   : > { %v313_v32 = vpop.permute.xlu1 %312 }
 0x348   : > { %v321_v33 = vrot.slane %v313_v32, %v320_v31 }
 0x34a   : > { %v323_v34 = vmul.f32 %v321_v33, %v200_v0 }
 0x34c   : > { %324 = vst [vmem:[%s199_s21] sm:$0xff] %v323_v34 }
 0x34d   : > { %579 = shalt.err (!%p576_p3)
}
 0x34e   : > { %s580_s8 = scalar_lea.hbm %s338_s28, 128  ;;  %s584_s17 = scalar_lea.hbm %s838_s3, 256 }
 0x34f   : > { %p581_p12 = scmp.ne.s32.totalorder %s338_s28, %s580_s8  ;;  %p585_p4 = scmp.lt.s32.totalorder %s338_s28, %s838_s3 }
 0x350   : > { %p586_p6 = scmp.lt.s32.totalorder %s584_s17, %s580_s8 }
 0x351   : > { %p582_p5 = pnand %p581_p12, %p855_p11 }
 0x352   : > { %p587_p8 = por %p586_p6, %p585_p4 }
 0x353   : > { %p583_p7 = pneg %p582_p5 }
 0x355   : > { %p588_p9 = pnand %p587_p8, %p583_p7 }
 0x357   : > { %591 = shalt.err (!%p588_p9)
}
 0x358   : > { %453 = dma.vmem_to_hbm [thread:$0]  (%p855_p11), %s341_s22, 128, %s338_s28, %s326_s29  }
 0x359 PF: > { %s352_s18 = sand.u32 1, %s622_s12   ;;  %p856_p13 = scmp.ne.s32.totalorder %s844_s19, 0 }
 0x35a   : > { %p857_p10 = scmp.ge.s32.totalorder %s634_s15, 2  ;;  %s353_s20 = scalar_lea.sflag [#allocation4], %s352_s18 }
 0x35c   : > { %p464_p1 = pnand %p857_p10, %p856_p13 }
 0x35e   : > { %p465_p2 = pneg %p464_p1 }
 0x360   : > { %617 = dma.done.wait (%p465_p2), %s353_s20, 128  }
 0x361   : > { %619 = vsyncadd (%p465_p2), %s353_s20, 4294967168  ;;  %p17_p0 = scmp.ge.s32.totalorder %s710_s23, 4   ;;  %s858_s12 = smov %s626_s13 }
 0x362   : > { %s859_s13 = smov %s630_s14  ;;  %s860_s14 = smov %s737_s4 }
 0x363   : > { %s861_s15 = smov %s710_s23  ;;  %19 = sbr.rel (!%p17_p0) target bundleno = 6 (0x6), region = 81 }
 0x368   :  { %358 = vsyncpa [#allocation3], 1 }
 0x369   :  { %360 = vsyncpa [#allocation3 + $0x1], 1 }
 0x36a   :  { %361 = vsyncpa [#allocation6], 1 }
 0x36b   :  { %362 = vsyncpa [#allocation4], 1 }
 0x36c   :  { %364 = vsyncpa [#allocation4 + $0x1], 1 }

</bundles_post_ra>
